<compile_context>
chip_gen: v5e
topology: v5e:2x2
jax: 0.10.0
libtpu: 0.0.40
codegen_flags: <defaults>
</compile_context>

<pallas_src>
import functools

import jax
import jax.numpy as jnp
import numpy as np
from jax import lax
from jax.experimental import pallas as pl
from jax.experimental.pallas import tpu as pltpu

_LANES = 128
_SUBLANES = 8


def _tversky_partial_kernel(logits_ref, target_ref, a_ref, b_ref, tp_ref, e_ref,
                            *, ignore_value, unrolled):
    t = pl.program_id(1)

    @pl.when(t == 0)
    def _init():
        a_ref[...] = jnp.zeros_like(a_ref)
        b_ref[...] = jnp.zeros_like(b_ref)
        tp_ref[...] = jnp.zeros_like(tp_ref)

    xb = logits_ref[...]                               # native dtype (N, C, S, 128)
    n, c, s, l = xb.shape

    # Class-axis max is exact in the native dtype; only the subtract/exp need
    # f32, so the f32 cast fuses into the exp chain and no full-size f32 copy
    # of the logits block has to live in VMEM (matters for bf16 on v6e/v7x).
    m = jnp.max(xb, axis=1, keepdims=True).astype(jnp.float32)   # (N, 1, S, 128)

    tgt = target_ref[...].astype(jnp.int32)            # (N, S, 128)

    def fold(v):
        # (N, S, 128) -> (N, 8, 128): layout-preserving reshape + VPU adds over
        # the outer axis; the single cross-lane/sublane reduce is deferred to
        # JAX on the tiny partial outputs.
        # TODO(synk): on v7x (VALU-bound) this fold could be offloaded to the
        # idle MXU as a small ones-matrix matmul; kept on the VPU here to avoid
        # bf16-pass rounding of the prob terms.
        return jnp.sum(v.reshape(n, s // _SUBLANES, _SUBLANES, l), axis=1)

    def class_update(i, e_i, vinv):
        pv = e_i * vinv                                # probs_i * valid_mask
        hit = tgt == i                                 # onehot_i; ignore/pad never match
        sl = pl.ds(i * n, n)
        a_ref[0, sl] = a_ref[0, sl] + fold(pv)                           # A
        tp_ref[0, sl] = tp_ref[0, sl] + fold(jnp.where(hit, pv, 0.0))    # TP
        b_ref[0, sl] = b_ref[0, sl] + fold(hit.astype(jnp.float32))      # B

    if unrolled:
        # Small class count: static unrolled loop, exp table kept as a value.
        e = jnp.exp(xb.astype(jnp.float32) - m)        # (N, C, S, 128) f32
        inv_denom = pl.reciprocal(jnp.sum(e, axis=1), approx=True)       # EUP
        vinv = jnp.where(tgt == ignore_value, 0.0, inv_denom)
        for i in range(c):
            class_update(i, e[:, i], vinv)
    else:
        # Large class count: bounded-unroll fori_loop keeps vreg pressure and
        # compile time flat; exp table lives in an explicit VMEM scratch so the
        # per-class slab is a cheap dynamic ref slice.
        e_ref[...] = jnp.exp(xb.astype(jnp.float32) - m)
        inv_denom = pl.reciprocal(jnp.sum(e_ref[...], axis=1), approx=True)
        vinv = jnp.where(tgt == ignore_value, 0.0, inv_denom)

        def body(i, carry):
            e_i = e_ref[:, pl.ds(i, 1)][:, 0]          # (N, S, 128)
            class_update(i, e_i, vinv)
            return carry

        lax.fori_loop(0, c, body, 0, unroll=2)


def _tensorcores_per_chip():
    """Best-effort TensorCore count per chip (2 on v7x, 1 on v5e/v6e)."""
    try:
        info = pltpu.get_tpu_info()
        for name in ("num_tensorcores", "tensorcore_count", "num_cores",
                     "cores_per_chip"):
            val = getattr(info, name, None)
            if val:
                return max(1, min(4, int(val)))
    except Exception:
        pass
    try:
        kind = jax.devices()[0].device_kind.lower()
    except Exception:
        return 1
    return 2 if "v7" in kind else 1


def _choose_tile_rows(n, c, rows_cap, in_bytes, tgt_bytes, vmem_limit, sub):
    """Largest 128-lane-row tile that fits the VMEM budget (true live set)."""
    # Resident across the whole grid: 3 f32 (C*N, 8, 128) accumulators,
    # conservatively counted with 2 pipeline buffers each.
    fixed = 3 * 2 * c * n * _SUBLANES * _LANES * 4
    # Per 128-lane spatial row of one tile:
    #   logits DMA (x2 buffers)          : 2 * n*c*in_bytes * 128
    #   f32 exp table + one f32 temp     : 2 * n*c*4        * 128
    #   target DMA (x2 buffers)          : 2 * n*tgt_bytes  * 128
    #   int32 tgt, inv_denom/vinv, per-class transients: ~7 * n*4 * 128
    per_row = _LANES * (n * c * (2 * in_bytes + 8) + n * (2 * tgt_bytes + 28))
    budget = int(vmem_limit * 0.85) - fixed - (2 << 20)
    rows = sub
    while rows < 2048 and rows < rows_cap and (rows * 2) * per_row <= budget:
        rows *= 2
    return max(sub, min(rows, rows_cap))


def tversky_loss_pallas(pred, target, *, alpha=0.3, beta=0.7, smooth=1.0,
                        loss_weight=1.0, ignore_index=255, class_weight=None,
                        max_tile_rows=None, num_splits=None,
                        max_unrolled_classes=16):
    """Equivalent of TverskyLoss().forward(pred, target) -> scalar loss."""
    N, C, H, W = pred.shape
    HW = H * W
    ignore_index = int(ignore_index)
    # The padded-pixel trick, the dropped per-class valid-select and the
    # reference's `if i != ignore_index` class skip all assume the ignore label
    # is not a real class id.
    assert ignore_index < 0 or ignore_index >= C, (
        "tversky_loss_pallas requires ignore_index outside [0, num_classes)")

    in_bytes = jnp.dtype(pred.dtype).itemsize
    use_i8 = C <= 127                       # labels fit int8 after clamp; ignore -> -1
    tgt_bytes = 1 if use_i8 else 4
    ignore_value = -1 if use_i8 else ignore_index

    try:
        vmem_cap = int(pltpu.get_tpu_info().vmem_capacity_bytes)
    except Exception:
        vmem_cap = 64 * 1024 * 1024         # conservative (v7x-sized) fallback
    vmem_limit = max(32 << 20, min(vmem_cap * 3 // 4, 100 << 20))

    # Sublane multiple: 8 f32 / 16 bf16 logits, 32 for int8 targets.
    sub = max(_SUBLANES, 32 // in_bytes, 32 if use_i8 else _SUBLANES)

    rows = -(-HW // _LANES)
    rows_up = -(-rows // sub) * sub
    tile_rows = _choose_tile_rows(N, C, rows_up, in_bytes, tgt_bytes,
                                  vmem_limit, sub)
    if max_tile_rows is not None:
        tile_rows = min(tile_rows, max(sub, -(-max_tile_rows // sub) * sub))

    # Leading "parallel" axis sized to the real TensorCore count so v7x shards
    # the spatial reduction while single-TC chips pay no extra flush/padding.
    P = int(num_splits) if num_splits is not None else _tensorcores_per_chip()
    P = max(1, P)
    if rows_up < P * tile_rows:
        P = 1
    num_t = -(-rows_up // (P * tile_rows))
    rows_pad = P * num_t * tile_rows
    hw_pad = rows_pad * _LANES

    logits = pred.reshape(N, C, HW)                    # keep native dtype in HBM
    t32 = target.reshape(N, HW).astype(jnp.int32)
    # Reference semantics folded into the (XLA-fused) cast: non-ignore labels
    # are clamped to [0, C-1] (negatives -> 0, large -> C-1, counted as valid),
    # ignore pixels become `ignore_value`.  The kernel then needs no clip and
    # no per-class valid-select.
    t32 = jnp.where(t32 == ignore_index, jnp.int32(ignore_value),
                    jnp.clip(t32, 0, C - 1))
    if hw_pad != HW:
        # Padded pixels carry the ignore value -> contribute exactly 0.
        logits = jnp.pad(logits, ((0, 0), (0, 0), (0, hw_pad - HW)))
        t32 = jnp.pad(t32, ((0, 0), (0, hw_pad - HW)),
                      constant_values=ignore_value)
    tgt = t32.astype(jnp.int8) if use_i8 else t32
    logits = logits.reshape(N, C, rows_pad, _LANES)
    tgt = tgt.reshape(N, rows_pad, _LANES)

    unrolled = C <= max_unrolled_classes
    kernel = functools.partial(_tversky_partial_kernel,
                               ignore_value=int(ignore_value),
                               unrolled=unrolled)
    e_shape = (1, 1, _SUBLANES, _LANES) if unrolled else (N, C, tile_rows, _LANES)

    part_shape = jax.ShapeDtypeStruct((P, C * N, _SUBLANES, _LANES), jnp.float32)
    part_spec = pl.BlockSpec((1, C * N, _SUBLANES, _LANES),
                             lambda p, t: (p, 0, 0, 0))

    a_part, b_part, tp_part = pl.pallas_call(
        kernel,
        out_shape=(part_shape, part_shape, part_shape),
        grid_spec=pltpu.PrefetchScalarGridSpec(
            num_scalar_prefetch=0,
            grid=(P, num_t),
            in_specs=[
                # TODO(synk): on v5e, if profiles show exposed DMA at small C*N,
                # bump this spec to pipeline_mode=pl.Buffered(3).
                pl.BlockSpec((N, C, tile_rows, _LANES),
                             lambda p, t: (0, 0, p * num_t + t, 0)),
                pl.BlockSpec((N, tile_rows, _LANES),
                             lambda p, t: (0, p * num_t + t, 0)),
            ],
            out_specs=(part_spec, part_spec, part_spec),
            scratch_shapes=[pltpu.VMEM(e_shape, jnp.float32)],
        ),
        compiler_params=pltpu.CompilerParams(
            dimension_semantics=("parallel", "arbitrary"),
            vmem_limit_bytes=int(vmem_limit)),
    )(logits, tgt)

    def collapse(part):                                # (P, C*N, 8, 128) -> (N, C)
        return part.reshape(P, C, N, _SUBLANES, _LANES).sum(axis=(0, 3, 4)).T

    A, B, TP = collapse(a_part), collapse(b_part), collapse(tp_part)
    FP = A - TP                                        # sum probs*(1-onehot)*vm
    FN = B - TP                                        # sum (1-probs)*onehot*vm
    tversky = (TP + smooth) / (TP + alpha * FP + beta * FN + smooth)
    per_nc = 1.0 - tversky                             # per-(sample, class) loss

    if class_weight is not None:
        per_nc = per_nc * jnp.asarray(class_weight, jnp.float32)[None, :]

    # Reference skips class i == ignore_index; ignore_index is outside [0, C)
    # (asserted), so every class contributes here.
    per_sample = jnp.sum(per_nc, axis=1) / C
    return loss_weight * jnp.mean(per_sample)          # @weighted_loss 'mean'


def _reference_loss(pred, target, *, alpha=0.3, beta=0.7, smooth=1.0,
                    loss_weight=1.0, ignore_index=255, class_weight=None):
    """Plain-JAX transcription of the PyTorch module, for a sanity check."""
    probs = jax.nn.softmax(pred.astype(jnp.float32), axis=1)
    N, C = pred.shape[0], pred.shape[1]
    onehot = jax.nn.one_hot(jnp.clip(target, 0, C - 1), C, dtype=jnp.float32)
    valid = (target != ignore_index).astype(jnp.float32).reshape(N, -1)
    total = 0.0
    for i in range(C):
        p = probs[:, i].reshape(N, -1)
        t = onehot[..., i].reshape(N, -1)
        TP = jnp.sum(p * t * valid, axis=1)
        FP = jnp.sum(p * (1.0 - t) * valid, axis=1)
        FN = jnp.sum((1.0 - p) * t * valid, axis=1)
        tversky = (TP + smooth) / (TP + alpha * FP + beta * FN + smooth)
        cls_loss = jnp.mean(1.0 - tversky)             # inner @weighted_loss mean
        if class_weight is not None:
            cls_loss = cls_loss * class_weight[i]
        total = total + cls_loss
    return loss_weight * (total / C)


if __name__ == "__main__":
    key = jax.random.PRNGKey(0)
    k1, k2, k3, k4 = jax.random.split(key, 4)
    IGNORE = 255

    # Case 1: small f32 logits; single tile, unrolled class loop, padded tail.
    N, C, H, W = 2, 4, 16, 16
    pred = jax.random.normal(k1, (N, C, H, W), dtype=jnp.float32)
    labels = jax.random.randint(k2, (N, H, W), 0, C, dtype=jnp.int32)
    drop = jax.random.uniform(k3, (N, H, W)) < 0.1
    target = jnp.where(drop, jnp.int32(IGNORE), labels)

    loss = jax.block_until_ready(
        tversky_loss_pallas(pred, target, alpha=0.3, beta=0.7, smooth=1.0,
                            loss_weight=1.0, ignore_index=IGNORE))
    ref = jax.block_until_ready(
        _reference_loss(pred, target, alpha=0.3, beta=0.7, smooth=1.0,
                        loss_weight=1.0, ignore_index=IGNORE))
    # Tolerance allows for pl.reciprocal(approx=True) in the softmax denom.
    assert np.allclose(np.asarray(loss), np.asarray(ref), rtol=1e-3, atol=1e-4), (
        f"case1 mismatch: pallas={float(loss)} ref={float(ref)}")

    # Case 2: bf16 logits, class weights, int8 targets, forced small tile and
    # forced 2-way split + fori_loop class path so the multi-step (parallel x
    # arbitrary) grid, cross-step accumulation and dynamic-class indexing are
    # all exercised.
    N2, C2, H2, W2 = 2, 4, 128, 128
    k5, k6, k7 = jax.random.split(k4, 3)
    pred2 = jax.random.normal(k5, (N2, C2, H2, W2), dtype=jnp.float32)
    pred2_bf16 = pred2.astype(jnp.bfloat16)
    labels2 = jax.random.randint(k6, (N2, H2, W2), 0, C2, dtype=jnp.int32)
    drop2 = jax.random.uniform(k7, (N2, H2, W2)) < 0.1
    target2 = jnp.where(drop2, jnp.int32(IGNORE), labels2)
    cw = [0.5, 1.0, 1.5, 2.0]

    loss2 = jax.block_until_ready(
        tversky_loss_pallas(pred2_bf16, target2, ignore_index=IGNORE,
                            class_weight=cw, max_tile_rows=8,
                            num_splits=2, max_unrolled_classes=2))
    ref2 = jax.block_until_ready(
        _reference_loss(pred2_bf16, target2, ignore_index=IGNORE,
                        class_weight=cw))
    assert np.allclose(np.asarray(loss2), np.asarray(ref2), rtol=2e-3, atol=5e-4), (
        f"case2 mismatch: pallas={float(loss2)} ref={float(ref2)}")

    print("KERNEL_OK")
</pallas_src>

<mosaic_0001>
module attributes {stable_mosaic.version = 11 : i64} {
  func.func @_tversky_partial_kernel(%arg0: i32, %arg1: i32, %arg2: memref<2x4x32x128xf32, #tpu.memory_space<vmem>>, %arg3: memref<2x32x128xi8, #tpu.memory_space<vmem>>, %arg4: memref<1x8x8x128xf32, #tpu.memory_space<vmem>>, %arg5: memref<1x8x8x128xf32, #tpu.memory_space<vmem>>, %arg6: memref<1x8x8x128xf32, #tpu.memory_space<vmem>>, %arg7: memref<1x1x8x128xf32, #tpu.memory_space<vmem>>) attributes {dimension_semantics = [#tpu.dimension_semantics<parallel>, #tpu.dimension_semantics<arbitrary>], iteration_bounds = array<i64: 1, 1>, scalar_prefetch = 0 : i64, scratch_operands = 1 : i64, tpu.core_type = #tpu.core_type<tc>, window_params = [{transform_indices = @transform_0, window_bounds = array<i64: 2, 4, 32, 128>}, {transform_indices = @transform_1, window_bounds = array<i64: 2, 32, 128>}, {transform_indices = @transform_2, window_bounds = array<i64: 1, 8, 8, 128>}, {transform_indices = @transform_3, window_bounds = array<i64: 1, 8, 8, 128>}, {transform_indices = @transform_4, window_bounds = array<i64: 1, 8, 8, 128>}]} {
    %c0_i32 = arith.constant 0 : i32
    %0 = arith.cmpi eq, %arg1, %c0_i32 : i32
    %1 = arith.extui %0 : i1 to i32
    %c0_i32_0 = arith.constant 0 : i32
    %2 = arith.cmpi ne, %1, %c0_i32_0 : i32
    scf.if %2 {
      %cst_119 = arith.constant 0.000000e+00 : f32
      %149 = vector.broadcast %cst_119 : f32 to vector<1x8x8x128xf32>
      %c0_120 = arith.constant 0 : index
      %c0_121 = arith.constant 0 : index
      %c0_122 = arith.constant 0 : index
      %c0_123 = arith.constant 0 : index
      %150 = vector.load %arg4[%c0_120, %c0_121, %c0_122, %c0_123] : memref<1x8x8x128xf32, #tpu.memory_space<vmem>>, vector<1x8x8x128xf32>
      tpu.vector_store %arg4[%c0_120, %c0_121, %c0_122, %c0_123], %149 {strides = array<i32>} : memref<1x8x8x128xf32, #tpu.memory_space<vmem>>, vector<1x8x8x128xf32>,
      %cst_124 = arith.constant 0.000000e+00 : f32
      %151 = vector.broadcast %cst_124 : f32 to vector<1x8x8x128xf32>
      %c0_125 = arith.constant 0 : index
      %c0_126 = arith.constant 0 : index
      %c0_127 = arith.constant 0 : index
      %c0_128 = arith.constant 0 : index
      %152 = vector.load %arg5[%c0_125, %c0_126, %c0_127, %c0_128] : memref<1x8x8x128xf32, #tpu.memory_space<vmem>>, vector<1x8x8x128xf32>
      tpu.vector_store %arg5[%c0_125, %c0_126, %c0_127, %c0_128], %151 {strides = array<i32>} : memref<1x8x8x128xf32, #tpu.memory_space<vmem>>, vector<1x8x8x128xf32>,
      %cst_129 = arith.constant 0.000000e+00 : f32
      %153 = vector.broadcast %cst_129 : f32 to vector<1x8x8x128xf32>
      %c0_130 = arith.constant 0 : index
      %c0_131 = arith.constant 0 : index
      %c0_132 = arith.constant 0 : index
      %c0_133 = arith.constant 0 : index
      %154 = vector.load %arg6[%c0_130, %c0_131, %c0_132, %c0_133] : memref<1x8x8x128xf32, #tpu.memory_space<vmem>>, vector<1x8x8x128xf32>
      tpu.vector_store %arg6[%c0_130, %c0_131, %c0_132, %c0_133], %153 {strides = array<i32>} : memref<1x8x8x128xf32, #tpu.memory_space<vmem>>, vector<1x8x8x128xf32>,
    } else {
    }
    %c0 = arith.constant 0 : index
    %c0_1 = arith.constant 0 : index
    %c0_2 = arith.constant 0 : index
    %c0_3 = arith.constant 0 : index
    %3 = vector.load %arg2[%c0, %c0_1, %c0_2, %c0_3] : memref<2x4x32x128xf32, #tpu.memory_space<vmem>>, vector<2x4x32x128xf32>
    %cst = arith.constant dense<0xFF800000> : vector<2x32x128xf32>
    %4 = vector.multi_reduction <maximumf>, %3, %cst [1] : vector<2x4x32x128xf32> to vector<2x32x128xf32>
    %5 = vector.shape_cast %4 : vector<2x32x128xf32> to vector<2x1x32x128xf32>
    %c0_4 = arith.constant 0 : index
    %c0_5 = arith.constant 0 : index
    %c0_6 = arith.constant 0 : index
    %6 = vector.load %arg3[%c0_4, %c0_5, %c0_6] : memref<2x32x128xi8, #tpu.memory_space<vmem>>, vector<2x32x128xi8>
    %7 = arith.extsi %6 : vector<2x32x128xi8> to vector<2x32x128xi32>
    %8 = vector.broadcast %5 : vector<2x1x32x128xf32> to vector<2x4x32x128xf32>
    %9 = arith.subf %3, %8 : vector<2x4x32x128xf32>
    %10 = math.exp %9 : vector<2x4x32x128xf32>
    %cst_7 = arith.constant dense<0.000000e+00> : vector<2x32x128xf32>
    %11 = vector.multi_reduction <add>, %10, %cst_7 [1] : vector<2x4x32x128xf32> to vector<2x32x128xf32>
    %12 = tpu.reciprocal %11 {approx = true} : vector<2x32x128xf32> -> vector<2x32x128xf32>
    %c-1_i32 = arith.constant -1 : i32
    %13 = vector.broadcast %c-1_i32 : i32 to vector<2x32x128xi32>
    %14 = arith.cmpi eq, %7, %13 : vector<2x32x128xi32>
    %cst_8 = arith.constant 0.000000e+00 : f32
    %15 = vector.broadcast %cst_8 : f32 to vector<2x32x128xf32>
    %16 = arith.select %14, %15, %12 : vector<2x32x128xi1>, vector<2x32x128xf32>
    %17 = vector.extract_strided_slice %10 {offsets = [0, 0, 0, 0], sizes = [2, 1, 32, 128], strides = [1, 1, 1, 1]} : vector<2x4x32x128xf32> to vector<2x1x32x128xf32>
    %18 = vector.shape_cast %17 : vector<2x1x32x128xf32> to vector<2x32x128xf32>
    %19 = arith.mulf %18, %16 : vector<2x32x128xf32>
    %c0_i32_9 = arith.constant 0 : i32
    %20 = vector.broadcast %c0_i32_9 : i32 to vector<2x32x128xi32>
    %21 = arith.cmpi eq, %7, %20 : vector<2x32x128xi32>
    %c0_10 = arith.constant 0 : index
    %c0_11 = arith.constant 0 : index
    %c0_12 = arith.constant 0 : index
    %c0_13 = arith.constant 0 : index
    %22 = vector.load %arg4[%c0_10, %c0_11, %c0_12, %c0_13] : memref<1x8x8x128xf32, #tpu.memory_space<vmem>>, vector<1x2x8x128xf32>
    %23 = vector.shape_cast %22 : vector<1x2x8x128xf32> to vector<2x8x128xf32>
    %24 = vector.shape_cast %19 : vector<2x32x128xf32> to vector<2x4x8x128xf32>
    %cst_14 = arith.constant dense<0.000000e+00> : vector<2x8x128xf32>
    %25 = vector.multi_reduction <add>, %24, %cst_14 [1] : vector<2x4x8x128xf32> to vector<2x8x128xf32>
    %26 = arith.addf %23, %25 : vector<2x8x128xf32>
    %c0_15 = arith.constant 0 : index
    %c0_16 = arith.constant 0 : index
    %c0_17 = arith.constant 0 : index
    %c0_18 = arith.constant 0 : index
    %27 = vector.load %arg4[%c0_15, %c0_16, %c0_17, %c0_18] : memref<1x8x8x128xf32, #tpu.memory_space<vmem>>, vector<1x2x8x128xf32>
    %28 = vector.shape_cast %27 : vector<1x2x8x128xf32> to vector<2x8x128xf32>
    %29 = vector.shape_cast %26 : vector<2x8x128xf32> to vector<1x2x8x128xf32>
    tpu.vector_store %arg4[%c0_15, %c0_16, %c0_17, %c0_18], %29 {strides = array<i32>} : memref<1x8x8x128xf32, #tpu.memory_space<vmem>>, vector<1x2x8x128xf32>,
    %c0_19 = arith.constant 0 : index
    %c0_20 = arith.constant 0 : index
    %c0_21 = arith.constant 0 : index
    %c0_22 = arith.constant 0 : index
    %30 = vector.load %arg6[%c0_19, %c0_20, %c0_21, %c0_22] : memref<1x8x8x128xf32, #tpu.memory_space<vmem>>, vector<1x2x8x128xf32>
    %31 = vector.shape_cast %30 : vector<1x2x8x128xf32> to vector<2x8x128xf32>
    %cst_23 = arith.constant 0.000000e+00 : f32
    %32 = vector.broadcast %cst_23 : f32 to vector<2x32x128xf32>
    %33 = arith.select %21, %19, %32 : vector<2x32x128xi1>, vector<2x32x128xf32>
    %34 = vector.shape_cast %33 : vector<2x32x128xf32> to vector<2x4x8x128xf32>
    %cst_24 = arith.constant dense<0.000000e+00> : vector<2x8x128xf32>
    %35 = vector.multi_reduction <add>, %34, %cst_24 [1] : vector<2x4x8x128xf32> to vector<2x8x128xf32>
    %36 = arith.addf %31, %35 : vector<2x8x128xf32>
    %c0_25 = arith.constant 0 : index
    %c0_26 = arith.constant 0 : index
    %c0_27 = arith.constant 0 : index
    %c0_28 = arith.constant 0 : index
    %37 = vector.load %arg6[%c0_25, %c0_26, %c0_27, %c0_28] : memref<1x8x8x128xf32, #tpu.memory_space<vmem>>, vector<1x2x8x128xf32>
    %38 = vector.shape_cast %37 : vector<1x2x8x128xf32> to vector<2x8x128xf32>
    %39 = vector.shape_cast %36 : vector<2x8x128xf32> to vector<1x2x8x128xf32>
    tpu.vector_store %arg6[%c0_25, %c0_26, %c0_27, %c0_28], %39 {strides = array<i32>} : memref<1x8x8x128xf32, #tpu.memory_space<vmem>>, vector<1x2x8x128xf32>,
    %c0_29 = arith.constant 0 : index
    %c0_30 = arith.constant 0 : index
    %c0_31 = arith.constant 0 : index
    %c0_32 = arith.constant 0 : index
    %40 = vector.load %arg5[%c0_29, %c0_30, %c0_31, %c0_32] : memref<1x8x8x128xf32, #tpu.memory_space<vmem>>, vector<1x2x8x128xf32>
    %41 = vector.shape_cast %40 : vector<1x2x8x128xf32> to vector<2x8x128xf32>
    %42 = arith.extui %21 : vector<2x32x128xi1> to vector<2x32x128xi32>
    %43 = arith.sitofp %42 : vector<2x32x128xi32> to vector<2x32x128xf32>
    %44 = vector.shape_cast %43 : vector<2x32x128xf32> to vector<2x4x8x128xf32>
    %cst_33 = arith.constant dense<0.000000e+00> : vector<2x8x128xf32>
    %45 = vector.multi_reduction <add>, %44, %cst_33 [1] : vector<2x4x8x128xf32> to vector<2x8x128xf32>
    %46 = arith.addf %41, %45 : vector<2x8x128xf32>
    %c0_34 = arith.constant 0 : index
    %c0_35 = arith.constant 0 : index
    %c0_36 = arith.constant 0 : index
    %c0_37 = arith.constant 0 : index
    %47 = vector.load %arg5[%c0_34, %c0_35, %c0_36, %c0_37] : memref<1x8x8x128xf32, #tpu.memory_space<vmem>>, vector<1x2x8x128xf32>
    %48 = vector.shape_cast %47 : vector<1x2x8x128xf32> to vector<2x8x128xf32>
    %49 = vector.shape_cast %46 : vector<2x8x128xf32> to vector<1x2x8x128xf32>
    tpu.vector_store %arg5[%c0_34, %c0_35, %c0_36, %c0_37], %49 {strides = array<i32>} : memref<1x8x8x128xf32, #tpu.memory_space<vmem>>, vector<1x2x8x128xf32>,
    %50 = vector.extract_strided_slice %10 {offsets = [0, 1, 0, 0], sizes = [2, 1, 32, 128], strides = [1, 1, 1, 1]} : vector<2x4x32x128xf32> to vector<2x1x32x128xf32>
    %51 = vector.shape_cast %50 : vector<2x1x32x128xf32> to vector<2x32x128xf32>
    %52 = arith.mulf %51, %16 : vector<2x32x128xf32>
    %c1_i32 = arith.constant 1 : i32
    %53 = vector.broadcast %c1_i32 : i32 to vector<2x32x128xi32>
    %54 = arith.cmpi eq, %7, %53 : vector<2x32x128xi32>
    %c0_38 = arith.constant 0 : index
    %c2 = arith.constant 2 : index
    %c0_39 = arith.constant 0 : index
    %c0_40 = arith.constant 0 : index
    %55 = vector.load %arg4[%c0_38, %c2, %c0_39, %c0_40] : memref<1x8x8x128xf32, #tpu.memory_space<vmem>>, vector<1x2x8x128xf32>
    %56 = vector.shape_cast %55 : vector<1x2x8x128xf32> to vector<2x8x128xf32>
    %57 = vector.shape_cast %52 : vector<2x32x128xf32> to vector<2x4x8x128xf32>
    %cst_41 = arith.constant dense<0.000000e+00> : vector<2x8x128xf32>
    %58 = vector.multi_reduction <add>, %57, %cst_41 [1] : vector<2x4x8x128xf32> to vector<2x8x128xf32>
    %59 = arith.addf %56, %58 : vector<2x8x128xf32>
    %c0_42 = arith.constant 0 : index
    %c2_43 = arith.constant 2 : index
    %c0_44 = arith.constant 0 : index
    %c0_45 = arith.constant 0 : index
    %60 = vector.load %arg4[%c0_42, %c2_43, %c0_44, %c0_45] : memref<1x8x8x128xf32, #tpu.memory_space<vmem>>, vector<1x2x8x128xf32>
    %61 = vector.shape_cast %60 : vector<1x2x8x128xf32> to vector<2x8x128xf32>
    %62 = vector.shape_cast %59 : vector<2x8x128xf32> to vector<1x2x8x128xf32>
    tpu.vector_store %arg4[%c0_42, %c2_43, %c0_44, %c0_45], %62 {strides = array<i32>} : memref<1x8x8x128xf32, #tpu.memory_space<vmem>>, vector<1x2x8x128xf32>,
    %c0_46 = arith.constant 0 : index
    %c2_47 = arith.constant 2 : index
    %c0_48 = arith.constant 0 : index
    %c0_49 = arith.constant 0 : index
    %63 = vector.load %arg6[%c0_46, %c2_47, %c0_48, %c0_49] : memref<1x8x8x128xf32, #tpu.memory_space<vmem>>, vector<1x2x8x128xf32>
    %64 = vector.shape_cast %63 : vector<1x2x8x128xf32> to vector<2x8x128xf32>
    %cst_50 = arith.constant 0.000000e+00 : f32
    %65 = vector.broadcast %cst_50 : f32 to vector<2x32x128xf32>
    %66 = arith.select %54, %52, %65 : vector<2x32x128xi1>, vector<2x32x128xf32>
    %67 = vector.shape_cast %66 : vector<2x32x128xf32> to vector<2x4x8x128xf32>
    %cst_51 = arith.constant dense<0.000000e+00> : vector<2x8x128xf32>
    %68 = vector.multi_reduction <add>, %67, %cst_51 [1] : vector<2x4x8x128xf32> to vector<2x8x128xf32>
    %69 = arith.addf %64, %68 : vector<2x8x128xf32>
    %c0_52 = arith.constant 0 : index
    %c2_53 = arith.constant 2 : index
    %c0_54 = arith.constant 0 : index
    %c0_55 = arith.constant 0 : index
    %70 = vector.load %arg6[%c0_52, %c2_53, %c0_54, %c0_55] : memref<1x8x8x128xf32, #tpu.memory_space<vmem>>, vector<1x2x8x128xf32>
    %71 = vector.shape_cast %70 : vector<1x2x8x128xf32> to vector<2x8x128xf32>
    %72 = vector.shape_cast %69 : vector<2x8x128xf32> to vector<1x2x8x128xf32>
    tpu.vector_store %arg6[%c0_52, %c2_53, %c0_54, %c0_55], %72 {strides = array<i32>} : memref<1x8x8x128xf32, #tpu.memory_space<vmem>>, vector<1x2x8x128xf32>,
    %c0_56 = arith.constant 0 : index
    %c2_57 = arith.constant 2 : index
    %c0_58 = arith.constant 0 : index
    %c0_59 = arith.constant 0 : index
    %73 = vector.load %arg5[%c0_56, %c2_57, %c0_58, %c0_59] : memref<1x8x8x128xf32, #tpu.memory_space<vmem>>, vector<1x2x8x128xf32>
    %74 = vector.shape_cast %73 : vector<1x2x8x128xf32> to vector<2x8x128xf32>
    %75 = arith.extui %54 : vector<2x32x128xi1> to vector<2x32x128xi32>
    %76 = arith.sitofp %75 : vector<2x32x128xi32> to vector<2x32x128xf32>
    %77 = vector.shape_cast %76 : vector<2x32x128xf32> to vector<2x4x8x128xf32>
    %cst_60 = arith.constant dense<0.000000e+00> : vector<2x8x128xf32>
    %78 = vector.multi_reduction <add>, %77, %cst_60 [1] : vector<2x4x8x128xf32> to vector<2x8x128xf32>
    %79 = arith.addf %74, %78 : vector<2x8x128xf32>
    %c0_61 = arith.constant 0 : index
    %c2_62 = arith.constant 2 : index
    %c0_63 = arith.constant 0 : index
    %c0_64 = arith.constant 0 : index
    %80 = vector.load %arg5[%c0_61, %c2_62, %c0_63, %c0_64] : memref<1x8x8x128xf32, #tpu.memory_space<vmem>>, vector<1x2x8x128xf32>
    %81 = vector.shape_cast %80 : vector<1x2x8x128xf32> to vector<2x8x128xf32>
    %82 = vector.shape_cast %79 : vector<2x8x128xf32> to vector<1x2x8x128xf32>
    tpu.vector_store %arg5[%c0_61, %c2_62, %c0_63, %c0_64], %82 {strides = array<i32>} : memref<1x8x8x128xf32, #tpu.memory_space<vmem>>, vector<1x2x8x128xf32>,
    %83 = vector.extract_strided_slice %10 {offsets = [0, 2, 0, 0], sizes = [2, 1, 32, 128], strides = [1, 1, 1, 1]} : vector<2x4x32x128xf32> to vector<2x1x32x128xf32>
    %84 = vector.shape_cast %83 : vector<2x1x32x128xf32> to vector<2x32x128xf32>
    %85 = arith.mulf %84, %16 : vector<2x32x128xf32>
    %c2_i32 = arith.constant 2 : i32
    %86 = vector.broadcast %c2_i32 : i32 to vector<2x32x128xi32>
    %87 = arith.cmpi eq, %7, %86 : vector<2x32x128xi32>
    %c0_65 = arith.constant 0 : index
    %c4 = arith.constant 4 : index
    %c0_66 = arith.constant 0 : index
    %c0_67 = arith.constant 0 : index
    %88 = vector.load %arg4[%c0_65, %c4, %c0_66, %c0_67] : memref<1x8x8x128xf32, #tpu.memory_space<vmem>>, vector<1x2x8x128xf32>
    %89 = vector.shape_cast %88 : vector<1x2x8x128xf32> to vector<2x8x128xf32>
    %90 = vector.shape_cast %85 : vector<2x32x128xf32> to vector<2x4x8x128xf32>
    %cst_68 = arith.constant dense<0.000000e+00> : vector<2x8x128xf32>
    %91 = vector.multi_reduction <add>, %90, %cst_68 [1] : vector<2x4x8x128xf32> to vector<2x8x128xf32>
    %92 = arith.addf %89, %91 : vector<2x8x128xf32>
    %c0_69 = arith.constant 0 : index
    %c4_70 = arith.constant 4 : index
    %c0_71 = arith.constant 0 : index
    %c0_72 = arith.constant 0 : index
    %93 = vector.load %arg4[%c0_69, %c4_70, %c0_71, %c0_72] : memref<1x8x8x128xf32, #tpu.memory_space<vmem>>, vector<1x2x8x128xf32>
    %94 = vector.shape_cast %93 : vector<1x2x8x128xf32> to vector<2x8x128xf32>
    %95 = vector.shape_cast %92 : vector<2x8x128xf32> to vector<1x2x8x128xf32>
    tpu.vector_store %arg4[%c0_69, %c4_70, %c0_71, %c0_72], %95 {strides = array<i32>} : memref<1x8x8x128xf32, #tpu.memory_space<vmem>>, vector<1x2x8x128xf32>,
    %c0_73 = arith.constant 0 : index
    %c4_74 = arith.constant 4 : index
    %c0_75 = arith.constant 0 : index
    %c0_76 = arith.constant 0 : index
    %96 = vector.load %arg6[%c0_73, %c4_74, %c0_75, %c0_76] : memref<1x8x8x128xf32, #tpu.memory_space<vmem>>, vector<1x2x8x128xf32>
    %97 = vector.shape_cast %96 : vector<1x2x8x128xf32> to vector<2x8x128xf32>
    %cst_77 = arith.constant 0.000000e+00 : f32
    %98 = vector.broadcast %cst_77 : f32 to vector<2x32x128xf32>
    %99 = arith.select %87, %85, %98 : vector<2x32x128xi1>, vector<2x32x128xf32>
    %100 = vector.shape_cast %99 : vector<2x32x128xf32> to vector<2x4x8x128xf32>
    %cst_78 = arith.constant dense<0.000000e+00> : vector<2x8x128xf32>
    %101 = vector.multi_reduction <add>, %100, %cst_78 [1] : vector<2x4x8x128xf32> to vector<2x8x128xf32>
    %102 = arith.addf %97, %101 : vector<2x8x128xf32>
    %c0_79 = arith.constant 0 : index
    %c4_80 = arith.constant 4 : index
    %c0_81 = arith.constant 0 : index
    %c0_82 = arith.constant 0 : index
    %103 = vector.load %arg6[%c0_79, %c4_80, %c0_81, %c0_82] : memref<1x8x8x128xf32, #tpu.memory_space<vmem>>, vector<1x2x8x128xf32>
    %104 = vector.shape_cast %103 : vector<1x2x8x128xf32> to vector<2x8x128xf32>
    %105 = vector.shape_cast %102 : vector<2x8x128xf32> to vector<1x2x8x128xf32>
    tpu.vector_store %arg6[%c0_79, %c4_80, %c0_81, %c0_82], %105 {strides = array<i32>} : memref<1x8x8x128xf32, #tpu.memory_space<vmem>>, vector<1x2x8x128xf32>,
    %c0_83 = arith.constant 0 : index
    %c4_84 = arith.constant 4 : index
    %c0_85 = arith.constant 0 : index
    %c0_86 = arith.constant 0 : index
    %106 = vector.load %arg5[%c0_83, %c4_84, %c0_85, %c0_86] : memref<1x8x8x128xf32, #tpu.memory_space<vmem>>, vector<1x2x8x128xf32>
    %107 = vector.shape_cast %106 : vector<1x2x8x128xf32> to vector<2x8x128xf32>
    %108 = arith.extui %87 : vector<2x32x128xi1> to vector<2x32x128xi32>
    %109 = arith.sitofp %108 : vector<2x32x128xi32> to vector<2x32x128xf32>
    %110 = vector.shape_cast %109 : vector<2x32x128xf32> to vector<2x4x8x128xf32>
    %cst_87 = arith.constant dense<0.000000e+00> : vector<2x8x128xf32>
    %111 = vector.multi_reduction <add>, %110, %cst_87 [1] : vector<2x4x8x128xf32> to vector<2x8x128xf32>
    %112 = arith.addf %107, %111 : vector<2x8x128xf32>
    %c0_88 = arith.constant 0 : index
    %c4_89 = arith.constant 4 : index
    %c0_90 = arith.constant 0 : index
    %c0_91 = arith.constant 0 : index
    %113 = vector.load %arg5[%c0_88, %c4_89, %c0_90, %c0_91] : memref<1x8x8x128xf32, #tpu.memory_space<vmem>>, vector<1x2x8x128xf32>
    %114 = vector.shape_cast %113 : vector<1x2x8x128xf32> to vector<2x8x128xf32>
    %115 = vector.shape_cast %112 : vector<2x8x128xf32> to vector<1x2x8x128xf32>
    tpu.vector_store %arg5[%c0_88, %c4_89, %c0_90, %c0_91], %115 {strides = array<i32>} : memref<1x8x8x128xf32, #tpu.memory_space<vmem>>, vector<1x2x8x128xf32>,
    %116 = vector.extract_strided_slice %10 {offsets = [0, 3, 0, 0], sizes = [2, 1, 32, 128], strides = [1, 1, 1, 1]} : vector<2x4x32x128xf32> to vector<2x1x32x128xf32>
    %117 = vector.shape_cast %116 : vector<2x1x32x128xf32> to vector<2x32x128xf32>
    %118 = arith.mulf %117, %16 : vector<2x32x128xf32>
    %c3_i32 = arith.constant 3 : i32
    %119 = vector.broadcast %c3_i32 : i32 to vector<2x32x128xi32>
    %120 = arith.cmpi eq, %7, %119 : vector<2x32x128xi32>
    %c0_92 = arith.constant 0 : index
    %c6 = arith.constant 6 : index
    %c0_93 = arith.constant 0 : index
    %c0_94 = arith.constant 0 : index
    %121 = vector.load %arg4[%c0_92, %c6, %c0_93, %c0_94] : memref<1x8x8x128xf32, #tpu.memory_space<vmem>>, vector<1x2x8x128xf32>
    %122 = vector.shape_cast %121 : vector<1x2x8x128xf32> to vector<2x8x128xf32>
    %123 = vector.shape_cast %118 : vector<2x32x128xf32> to vector<2x4x8x128xf32>
    %cst_95 = arith.constant dense<0.000000e+00> : vector<2x8x128xf32>
    %124 = vector.multi_reduction <add>, %123, %cst_95 [1] : vector<2x4x8x128xf32> to vector<2x8x128xf32>
    %125 = arith.addf %122, %124 : vector<2x8x128xf32>
    %c0_96 = arith.constant 0 : index
    %c6_97 = arith.constant 6 : index
    %c0_98 = arith.constant 0 : index
    %c0_99 = arith.constant 0 : index
    %126 = vector.load %arg4[%c0_96, %c6_97, %c0_98, %c0_99] : memref<1x8x8x128xf32, #tpu.memory_space<vmem>>, vector<1x2x8x128xf32>
    %127 = vector.shape_cast %126 : vector<1x2x8x128xf32> to vector<2x8x128xf32>
    %128 = vector.shape_cast %125 : vector<2x8x128xf32> to vector<1x2x8x128xf32>
    tpu.vector_store %arg4[%c0_96, %c6_97, %c0_98, %c0_99], %128 {strides = array<i32>} : memref<1x8x8x128xf32, #tpu.memory_space<vmem>>, vector<1x2x8x128xf32>,
    %c0_100 = arith.constant 0 : index
    %c6_101 = arith.constant 6 : index
    %c0_102 = arith.constant 0 : index
    %c0_103 = arith.constant 0 : index
    %129 = vector.load %arg6[%c0_100, %c6_101, %c0_102, %c0_103] : memref<1x8x8x128xf32, #tpu.memory_space<vmem>>, vector<1x2x8x128xf32>
    %130 = vector.shape_cast %129 : vector<1x2x8x128xf32> to vector<2x8x128xf32>
    %cst_104 = arith.constant 0.000000e+00 : f32
    %131 = vector.broadcast %cst_104 : f32 to vector<2x32x128xf32>
    %132 = arith.select %120, %118, %131 : vector<2x32x128xi1>, vector<2x32x128xf32>
    %133 = vector.shape_cast %132 : vector<2x32x128xf32> to vector<2x4x8x128xf32>
    %cst_105 = arith.constant dense<0.000000e+00> : vector<2x8x128xf32>
    %134 = vector.multi_reduction <add>, %133, %cst_105 [1] : vector<2x4x8x128xf32> to vector<2x8x128xf32>
    %135 = arith.addf %130, %134 : vector<2x8x128xf32>
    %c0_106 = arith.constant 0 : index
    %c6_107 = arith.constant 6 : index
    %c0_108 = arith.constant 0 : index
    %c0_109 = arith.constant 0 : index
    %136 = vector.load %arg6[%c0_106, %c6_107, %c0_108, %c0_109] : memref<1x8x8x128xf32, #tpu.memory_space<vmem>>, vector<1x2x8x128xf32>
    %137 = vector.shape_cast %136 : vector<1x2x8x128xf32> to vector<2x8x128xf32>
    %138 = vector.shape_cast %135 : vector<2x8x128xf32> to vector<1x2x8x128xf32>
    tpu.vector_store %arg6[%c0_106, %c6_107, %c0_108, %c0_109], %138 {strides = array<i32>} : memref<1x8x8x128xf32, #tpu.memory_space<vmem>>, vector<1x2x8x128xf32>,
    %c0_110 = arith.constant 0 : index
    %c6_111 = arith.constant 6 : index
    %c0_112 = arith.constant 0 : index
    %c0_113 = arith.constant 0 : index
    %139 = vector.load %arg5[%c0_110, %c6_111, %c0_112, %c0_113] : memref<1x8x8x128xf32, #tpu.memory_space<vmem>>, vector<1x2x8x128xf32>
    %140 = vector.shape_cast %139 : vector<1x2x8x128xf32> to vector<2x8x128xf32>
    %141 = arith.extui %120 : vector<2x32x128xi1> to vector<2x32x128xi32>
    %142 = arith.sitofp %141 : vector<2x32x128xi32> to vector<2x32x128xf32>
    %143 = vector.shape_cast %142 : vector<2x32x128xf32> to vector<2x4x8x128xf32>
    %cst_114 = arith.constant dense<0.000000e+00> : vector<2x8x128xf32>
    %144 = vector.multi_reduction <add>, %143, %cst_114 [1] : vector<2x4x8x128xf32> to vector<2x8x128xf32>
    %145 = arith.addf %140, %144 : vector<2x8x128xf32>
    %c0_115 = arith.constant 0 : index
    %c6_116 = arith.constant 6 : index
    %c0_117 = arith.constant 0 : index
    %c0_118 = arith.constant 0 : index
    %146 = vector.load %arg5[%c0_115, %c6_116, %c0_117, %c0_118] : memref<1x8x8x128xf32, #tpu.memory_space<vmem>>, vector<1x2x8x128xf32>
    %147 = vector.shape_cast %146 : vector<1x2x8x128xf32> to vector<2x8x128xf32>
    %148 = vector.shape_cast %145 : vector<2x8x128xf32> to vector<1x2x8x128xf32>
    tpu.vector_store %arg5[%c0_115, %c6_116, %c0_117, %c0_118], %148 {strides = array<i32>} : memref<1x8x8x128xf32, #tpu.memory_space<vmem>>, vector<1x2x8x128xf32>,
    return
  }
  func.func @transform_0(%arg0: i32, %arg1: i32) -> (i32, i32, i32, i32) {
    %c1_i32 = arith.constant 1 : i32
    %0 = arith.muli %arg0, %c1_i32 : i32
    %1 = arith.addi %0, %arg1 : i32
    %c0_i32 = arith.constant 0 : i32
    %c0_i32_0 = arith.constant 0 : i32
    %c0_i32_1 = arith.constant 0 : i32
    %c0_i32_2 = arith.constant 0 : i32
    return %c0_i32, %c0_i32_0, %1, %c0_i32_1 : i32, i32, i32, i32
  }
  func.func @transform_1(%arg0: i32, %arg1: i32) -> (i32, i32, i32) {
    %c1_i32 = arith.constant 1 : i32
    %0 = arith.muli %arg0, %c1_i32 : i32
    %1 = arith.addi %0, %arg1 : i32
    %c0_i32 = arith.constant 0 : i32
    %c0_i32_0 = arith.constant 0 : i32
    %c0_i32_1 = arith.constant 0 : i32
    return %c0_i32, %1, %c0_i32_0 : i32, i32, i32
  }
  func.func @transform_2(%arg0: i32, %arg1: i32) -> (i32, i32, i32, i32) {
    %c0_i32 = arith.constant 0 : i32
    %c0_i32_0 = arith.constant 0 : i32
    %c0_i32_1 = arith.constant 0 : i32
    %c0_i32_2 = arith.constant 0 : i32
    return %arg0, %c0_i32, %c0_i32_0, %c0_i32_1 : i32, i32, i32, i32
  }
  func.func @transform_3(%arg0: i32, %arg1: i32) -> (i32, i32, i32, i32) {
    %c0_i32 = arith.constant 0 : i32
    %c0_i32_0 = arith.constant 0 : i32
    %c0_i32_1 = arith.constant 0 : i32
    %c0_i32_2 = arith.constant 0 : i32
    return %arg0, %c0_i32, %c0_i32_0, %c0_i32_1 : i32, i32, i32, i32
  }
  func.func @transform_4(%arg0: i32, %arg1: i32) -> (i32, i32, i32, i32) {
    %c0_i32 = arith.constant 0 : i32
    %c0_i32_0 = arith.constant 0 : i32
    %c0_i32_1 = arith.constant 0 : i32
    %c0_i32_2 = arith.constant 0 : i32
    return %arg0, %c0_i32, %c0_i32_0, %c0_i32_1 : i32, i32, i32, i32
  }
}

</mosaic_0001>

<bundles_post_ra>
// kernel: tpu_custom_call.1
= control target key start
LH: loop header
LB: loop body
LE: loop exit
PB: predicated region body
PF: predicated region fallthrough
CT: control target
= control target key end

     0   :  { %10 = vsyncpa [#allocation4], 0  ;;  %s1549_s0 = inlined_call_operand.hbm [shape: f32[2,4,32,128], index: 0, kind: input, shape index: {}]   ;;  %s1550_s1 = inlined_call_operand.hbm [shape: s8[2,32,128], index: 1, kind: input, shape index: {}]   ;;  %s1551_s2 = inlined_call_operand.hbm [shape: f32[1,8,8,128], index: 2, kind: output, shape index: {0}]   ;;  %s1552_s3 = inlined_call_operand.hbm [shape: f32[1,8,8,128], index: 3, kind: output, shape index: {1}]   ;;  %s1553_s4 = inlined_call_operand.hbm [shape: f32[1,8,8,128], index: 4, kind: output, shape index: {2}]  }
   0x1   :  { %11 = vsyncpa [#allocation7], 0 }
   0x2   :  { %12 = vsyncpa [#allocation5], 0 }
   0x3   :  { %13 = vsyncpa [#allocation10], 0  ;;  %s22_s17 = sshll.u32 %s1549_s0, 4  ;;  %s912_s18 = smov [#allocation3]   ;;  %s23_s17 = int_to_ptr.hbm [resolvable:$true] %s22_s17 }
   0x4   :  { %s24_s19 = sshll.u32 %s912_s18, 4  ;;  %s38_s22 = sshll.u32 %s1550_s1, 4  ;;  %s25_s19 = int_to_ptr.vmem [resolvable:$true] %s24_s19  ;;  %s39_s22 = int_to_ptr.hbm [resolvable:$true] %s38_s22 }
   0x5   :  { %s913_s23 = smov 128   ;;  %s914_s24 = smov 8  }
   0x6   :  { %30 = dma.hbm_to_vmem [thread:$0]  %s23_s17, 4096, %s25_s19, [#allocation4], %s913_s23, %s913_s23, %s914_s24  }
   0x7   :  { %s915_s25 = smov [#allocation6]  }
   0x8   :  { %s40_s26 = sshll.u32 %s915_s25, 4  ;;  %s41_s26 = int_to_ptr.vmem [resolvable:$true] %s40_s26 }
   0x9   :  { %46 = dma.hbm_to_vmem [thread:$0]  %s39_s22, 256, %s41_s26, [#allocation7], %s913_s23, %s913_s23, %s914_s24  }
   0xa   :  { %904 = dma.done.wait [#allocation4], 4096  }
   0xb   :  { %905 = vsyncadd [#allocation4], 4294963200 }
   0xc   :  { %906 = dma.done.wait [#allocation7], 256  }
   0xd   :  { %907 = vsyncadd [#allocation7], 4294967040  ;;  %v142_v0 = vld [vmem:[#allocation6] sm:$0xff]  ;;  %v143_v1 = vld [vmem:[#allocation6 + $0x8] sm:$0xff]  ;;  %v916_v10 = vmov 0.0   ;;  %s917_s0 = smov [#allocation9]  }
   0xe   :  { %v957_v2 = vunpack.c.0.s8 %v142_v0  ;;  %v959_v3 = vunpack.c.1.s8 %v142_v0  ;;  %v961_v4 = vunpack.c.2.s8 %v142_v0  ;;  %v963_v5 = vunpack.c.3.s8 %v142_v0  ;;  %v1082_v55 = vld [vmem:[#allocation3] sm:$0xff]  ;;  %v1084_v56 = vld [vmem:[#allocation3 + $0x8] sm:$0xff]  ;;  %v1090_v59 = vld [vmem:[#allocation3 + $0x10] sm:$0xff]  ;;  %s626_s1 = sshll.u32 %s917_s0, 4  ;;  %s628_s29 = sshll.u32 %s1552_s3, 4  ;;  %s627_s1 = int_to_ptr.vmem [resolvable:$true] %s626_s1  ;;  %s629_s29 = int_to_ptr.hbm [resolvable:$true] %s628_s29 }
   0xf   :  { %v965_v6 = vunpack.c.0.s8 %v143_v1  ;;  %v967_v7 = vunpack.c.1.s8 %v143_v1  ;;  %v969_v8 = vunpack.c.2.s8 %v143_v1  ;;  %v971_v9 = vunpack.c.3.s8 %v143_v1  ;;  %v1092_v60 = vld [vmem:[#allocation3 + $0x18] sm:$0xff]  ;;  %v1094_v61 = vld [vmem:[#allocation3 + $0x20] sm:$0xff]  ;;  %v1099_v63 = vld [vmem:[#allocation3 + $0x28] sm:$0xff]  ;;  %s918_s3 = smov [#allocation8]   ;;  %s615_s7 = sshll.u32 %s1551_s2, 4  ;;  %s616_s7 = int_to_ptr.hbm [resolvable:$true] %s615_s7 }
  0x10   :  { %vm304_vm0 = vcmp.eq.s32.totalorder %v957_v2, 0  ;;  %vm305_vm1 = vcmp.eq.s32.totalorder %v959_v3, 0  ;;  %vm306_vm2 = vcmp.eq.s32.totalorder %v961_v4, 0  ;;  %vm307_vm3 = vcmp.eq.s32.totalorder %v963_v5, 0  ;;  %v1101_v0 = vld [vmem:[#allocation3 + $0x30] sm:$0xff]  ;;  %v1103_v1 = vld [vmem:[#allocation3 + $0x38] sm:$0xff] }
  0x11   :  { %v664_v11 = vsel %vm304_vm0, 1.0, %v916_v10  ;;  %v665_v12 = vsel %vm305_vm1, 1.0, %v916_v10  ;;  %v666_v13 = vsel %vm306_vm2, 1.0, %v916_v10  ;;  %v667_v14 = vsel %vm307_vm3, 1.0, %v916_v10  ;;  %s613_s30 = sshll.u32 %s918_s3, 4  ;;  %s919_s8 = smov [#allocation11]   ;;  %s614_s30 = int_to_ptr.vmem [resolvable:$true] %s613_s30 }
  0x12   :  { %v362_v15 = vadd.f32 %v665_v12, %v664_v11  ;;  %vm1561_vm4 = vcmp.eq.s32.totalorder %v965_v6, 0  ;;  %vm1557_vm5 = vcmp.eq.s32.totalorder %v967_v7, 0  ;;  %vm1555_vm6 = vcmp.eq.s32.totalorder %v969_v8, 0  ;;  %s639_s9 = sshll.u32 %s919_s8, 4  ;;  %s641_s12 = sshll.u32 %s1553_s4, 4  ;;  %s640_s9 = int_to_ptr.vmem [resolvable:$true] %s639_s9  ;;  %s642_s12 = int_to_ptr.hbm [resolvable:$true] %s641_s12 }
  0x13   :  { %vm1554_vm7 = vcmp.eq.s32.totalorder %v971_v9, 0  ;;  %v668_v16 = vsel %vm1561_vm4, 1.0, %v916_v10  ;;  %v669_v17 = vsel %vm1557_vm5, 1.0, %v916_v10  ;;  %v670_v18 = vsel %vm1555_vm6, 1.0, %v916_v10 }
  0x14   :  { %v363_v19 = vadd.f32 %v666_v13, %v362_v15  ;;  %v671_v20 = vsel %vm1554_vm7, 1.0, %v916_v10  ;;  %v365_v21 = vadd.f32 %v669_v17, %v668_v16  ;;  %vm380_vm8 = vcmp.eq.s32.totalorder %v957_v2, 1  ;;  %v1114_v15 = vld [vmem:[#allocation3 + $0x40] sm:$0xff] }
  0x15   :  { %vm381_vm9 = vcmp.eq.s32.totalorder %v959_v3, 1  ;;  %vm382_vm10 = vcmp.eq.s32.totalorder %v961_v4, 1  ;;  %vm383_vm11 = vcmp.eq.s32.totalorder %v963_v5, 1  ;;  %v672_v22 = vsel %vm380_vm8, 1.0, %v916_v10 }
  0x16   :  { %v364_v23 = vadd.f32 %v667_v14, %v363_v19  ;;  %v366_v24 = vadd.f32 %v670_v18, %v365_v21  ;;  %v673_v25 = vsel %vm381_vm9, 1.0, %v916_v10  ;;  %v674_v26 = vsel %vm382_vm10, 1.0, %v916_v10  ;;  %v1119_v18 = vld [vmem:[#allocation3 + $0x48] sm:$0xff]  ;;  %v1121_v19 = vld [vmem:[#allocation3 + $0x50] sm:$0xff] }
  0x17   :  { %v675_v27 = vsel %vm383_vm11, 1.0, %v916_v10  ;;  %v441_v28 = vadd.f32 %v673_v25, %v672_v22  ;;  %vm1556_vm12 = vcmp.eq.s32.totalorder %v965_v6, 1  ;;  %vm1560_vm13 = vcmp.eq.s32.totalorder %v967_v7, 1 }
  0x18   :  { %v367_v29 = vadd.f32 %v671_v20, %v366_v24  ;;  %vm1559_vm14 = vcmp.eq.s32.totalorder %v969_v8, 1  ;;  %vm1558_vm15 = vcmp.eq.s32.totalorder %v971_v9, 1  ;;  %v676_v31 = vsel %vm1556_vm12, 1.0, %v916_v10  ;;  %370 = vst [vmem:[#allocation9] sm:$0xff] %v364_v23  ;;  %v1123_v20 = vld [vmem:[#allocation3 + $0x58] sm:$0xff]  ;;  %v1127_v23 = vld [vmem:[#allocation3 + $0x60] sm:$0xff] }
  0x19   :  { %v442_v30 = vadd.f32 %v674_v26, %v441_v28  ;;  %v677_v32 = vsel %vm1560_vm13, 1.0, %v916_v10  ;;  %v678_v33 = vsel %vm1559_vm14, 1.0, %v916_v10  ;;  %v679_v34 = vsel %vm1558_vm15, 1.0, %v916_v10  ;;  %v1137_v28 = vld [vmem:[#allocation3 + $0x70] sm:$0xff] }
  0x1a   :  { %v444_v35 = vadd.f32 %v677_v32, %v676_v31  ;;  %vm459_vm7 = vcmp.eq.s32.totalorder %v957_v2, 2  ;;  %vm1565_vm6 = vcmp.eq.s32.totalorder %v959_v3, 2  ;;  %vm1563_vm12 = vcmp.eq.s32.totalorder %v961_v4, 2  ;;  %371 = vst [vmem:[#allocation9 + $0x8] sm:$0xff] %v367_v29  ;;  %v1139_v29 = vld [vmem:[#allocation3 + $0x78] sm:$0xff] }
  0x1b   :  { %v443_v36 = vadd.f32 %v675_v27, %v442_v30  ;;  %vm1562_vm5 = vcmp.eq.s32.totalorder %v963_v5, 2  ;;  %v680_v38 = vsel %vm459_vm7, 1.0, %v916_v10  ;;  %v681_v39 = vsel %vm1565_vm6, 1.0, %v916_v10  ;;  %v1135_v27 = vld [vmem:[#allocation3 + $0x68] sm:$0xff] }
  0x1c   :  { %v445_v37 = vadd.f32 %v678_v33, %v444_v35  ;;  %v682_v40 = vsel %vm1563_vm12, 1.0, %v916_v10  ;;  %v683_v41 = vsel %vm1562_vm5, 1.0, %v916_v10  ;;  %v520_v42 = vadd.f32 %v681_v39, %v680_v38 }
  0x1d   :  { %vm1564_vm15 = vcmp.eq.s32.totalorder %v965_v6, 2  ;;  %vm1569_vm14 = vcmp.eq.s32.totalorder %v967_v7, 2  ;;  %vm1568_vm13 = vcmp.eq.s32.totalorder %v969_v8, 2  ;;  %vm1566_vm4 = vcmp.eq.s32.totalorder %v971_v9, 2  ;;  %449 = vst [vmem:[#allocation9 + $0x10] sm:$0xff] %v443_v36  ;;  %v1151_v36 = vld [vmem:[#allocation3 + $0x80] sm:$0xff] }
  0x1e   :  { %v446_v43 = vadd.f32 %v679_v34, %v445_v37  ;;  %v521_v44 = vadd.f32 %v682_v40, %v520_v42  ;;  %v684_v45 = vsel %vm1564_vm15, 1.0, %v916_v10  ;;  %v685_v46 = vsel %vm1569_vm14, 1.0, %v916_v10  ;;  %v1153_v37 = vld [vmem:[#allocation3 + $0xa0] sm:$0xff] }
  0x1f   :  { %v686_v47 = vsel %vm1568_vm13, 1.0, %v916_v10  ;;  %v687_v48 = vsel %vm1566_vm4, 1.0, %v916_v10  ;;  %v523_v49 = vadd.f32 %v685_v46, %v684_v45  ;;  %vm538_vm5 = vcmp.eq.s32.totalorder %v957_v2, 3 }
  0x20   :  { %v522_v50 = vadd.f32 %v683_v41, %v521_v44  ;;  %vm539_vm12 = vcmp.eq.s32.totalorder %v959_v3, 3  ;;  %vm1567_vm15 = vcmp.eq.s32.totalorder %v961_v4, 3  ;;  %vm541_vm6 = vcmp.eq.s32.totalorder %v963_v5, 3  ;;  %450 = vst [vmem:[#allocation9 + $0x18] sm:$0xff] %v446_v43 }
  0x21   :  { %v524_v51 = vadd.f32 %v686_v47, %v523_v49  ;;  %v688_v52 = vsel %vm538_vm5, 1.0, %v916_v10  ;;  %v689_v53 = vsel %vm539_vm12, 1.0, %v916_v10  ;;  %v690_v54 = vsel %vm1567_vm15, 1.0, %v916_v10  ;;  %v1176_v47 = vld [vmem:[#allocation3 + $0xc0] sm:$0xff]  ;;  %v1180_v49 = vld [vmem:[#allocation3 + $0x88] sm:$0xff] }
  0x22   :  { %v691_v57 = vsel %vm541_vm6, 1.0, %v916_v10  ;;  %v599_v58 = vadd.f32 %v689_v53, %v688_v52  ;;  %vm1573_vm4 = vcmp.eq.s32.totalorder %v965_v6, 3  ;;  %vm1572_vm15 = vcmp.eq.s32.totalorder %v967_v7, 3  ;;  %528 = vst [vmem:[#allocation9 + $0x20] sm:$0xff] %v522_v50  ;;  %v1182_v50 = vld [vmem:[#allocation3 + $0xa8] sm:$0xff] }
  0x23   :  { %v525_v62 = vadd.f32 %v687_v48, %v524_v51  ;;  %vm1571_vm13 = vcmp.eq.s32.totalorder %v969_v8, 3  ;;  %vm1570_vm14 = vcmp.eq.s32.totalorder %v971_v9, 3  ;;  %v692_v12 = vsel %vm1573_vm4, 1.0, %v916_v10 }
  0x24   :  { %v600_v11 = vadd.f32 %v690_v54, %v599_v58  ;;  %v693_v13 = vsel %vm1572_vm15, 1.0, %v916_v10  ;;  %v694_v14 = vsel %vm1571_vm13, 1.0, %v916_v10  ;;  %v695_v16 = vsel %vm1570_vm14, 1.0, %v916_v10 }
  0x25   :  { %v602_v17 = vadd.f32 %v693_v13, %v692_v12  ;;  %v118_v21 = vmax.f32 %v1082_v55, %v1094_v61  ;;  %v121_v24 = vmax.f32 %v1084_v56, %v1099_v63  ;;  %v124_v25 = vmax.f32 %v1090_v59, %v1101_v0  ;;  %529 = vst [vmem:[#allocation9 + $0x28] sm:$0xff] %v525_v62  ;;  %v1198_v62 = vld [vmem:[#allocation3 + $0x98] sm:$0xff]  ;;  %v1208_v13 = vld [vmem:[#allocation3 + $0xb0] sm:$0xff] }
  0x26   :  { %v601_v22 = vadd.f32 %v691_v57, %v600_v11  ;;  %v127_v10 = vmax.f32 %v1092_v60, %v1103_v1  ;;  %v130_v45 = vmax.f32 %v1151_v36, %v1153_v37  ;;  %vm280_vm14 = vcmp.eq.s32.totalorder %v957_v2, 4294967295 }
  0x27   :  { %v603_v26 = vadd.f32 %v694_v14, %v602_v17  ;;  %v119_v30 = vmax.f32 %v118_v21, %v1114_v15  ;;  %v122_v31 = vmax.f32 %v121_v24, %v1119_v18  ;;  %v125_v32 = vmax.f32 %v124_v25, %v1121_v19  ;;  %v1210_v14 = vld [vmem:[#allocation3 + $0xb8] sm:$0xff]  ;;  %v1222_v24 = vld [vmem:[#allocation3 + $0xe8] sm:$0xff] }
  0x28   :  { %v128_v33 = vmax.f32 %v127_v10, %v1123_v20  ;;  %607 = vst [vmem:[#allocation9 + $0x30] sm:$0xff] %v601_v22  ;;  %v131_v58 = vmax.f32 %v130_v45, %v1176_v47  ;;  %v1220_v22 = vld [vmem:[#allocation3 + $0xd8] sm:$0xff]  ;;  %vm281_vm13 = vcmp.eq.s32.totalorder %v959_v3, 4294967295  ;;  %vm282_vm15 = vcmp.eq.s32.totalorder %v961_v4, 4294967295 }
  0x29   :  { %v604_v34 = vadd.f32 %v695_v16, %v603_v26  ;;  %v1149_v35 = vmax.f32 %v119_v30, %v1127_v23  ;;  %v1156_v38 = vmax.f32 %v122_v31, %v1135_v27  ;;  %v1159_v39 = vmax.f32 %v125_v32, %v1137_v28  ;;  %v1234_v32 = vld [vmem:[#allocation3 + $0xf0] sm:$0xff] }
  0x2a   :  { %v1162_v40 = vmax.f32 %v128_v33, %v1139_v29  ;;  %v139_v26 = vmax.f32 %v1198_v62, %v1210_v14  ;;  %v1236_v33 = vld [vmem:[#allocation3 + $0xf8] sm:$0xff]  ;;  %vm283_vm4 = vcmp.eq.s32.totalorder %v963_v5, 4294967295 }
  0x2b   :  { %v152_v41 = vsub.f32 %v1082_v55, %v1149_v35  ;;  %v153_v42 = vsub.f32 %v1084_v56, %v1156_v38  ;;  %v154_v43 = vsub.f32 %v1090_v59, %v1159_v39  ;;  %608 = vst [vmem:[#allocation9 + $0x38] sm:$0xff] %v604_v34  ;;  %v156_v46 = vsub.f32 %v1094_v61, %v1149_v35  ;;  %v1196_v61 = vld [vmem:[#allocation3 + $0x90] sm:$0xff] }
  0x2c   :  { %v155_v44 = vsub.f32 %v1092_v60, %v1162_v40  ;;  %v157_v48 = vsub.f32 %v1099_v63, %v1156_v38  ;;  %634 = dma.vmem_to_hbm [thread:$0]  %s627_s1, 1024, %s629_s29, [#allocation10], %s913_s23, %s913_s23, %s914_s24   ;;  %v158_v51 = vsub.f32 %v1101_v0, %v1159_v39  ;;  %v159_v55 = vsub.f32 %v1103_v1, %v1162_v40  ;;  %v1200_v63 = vld [vmem:[#allocation3 + $0xe0] sm:$0xff] }
  0x2d   :  { %v184_v52 = vmul.f32 1.442695, %v152_v41  ;;  %v186_v53 = vmul.f32 1.442695, %v153_v42  ;;  %v188_v54 = vmul.f32 1.442695, %v154_v43  ;;  %v160_v56 = vsub.f32 %v1114_v15, %v1149_v35 }
  0x2e   :  { %v190_v57 = vmul.f32 1.442695, %v155_v44  ;;  %v161_v59 = vsub.f32 %v1119_v18, %v1156_v38  ;;  %v192_v60 = vmul.f32 1.442695, %v156_v46  ;;  %v133_v0 = vmax.f32 %v1180_v49, %v1182_v50  ;;  %v1212_v15 = vld [vmem:[#allocation3 + $0xc8] sm:$0xff] }
  0x2f   :  { %704 = vpow2.f32 %v184_v52  ;;  %v162_v1 = vsub.f32 %v1121_v19, %v1159_v39  ;;  %v163_v11 = vsub.f32 %v1123_v20, %v1162_v40  ;;  %v194_v12 = vmul.f32 1.442695, %v157_v48  ;;  %v1218_v19 = vld [vmem:[#allocation3 + $0xd0] sm:$0xff] }
  0x30   :  { %706 = vpow2.f32 %v186_v53  ;;  %v164_v16 = vsub.f32 %v1127_v23, %v1149_v35  ;;  %v165_v17 = vsub.f32 %v1135_v27, %v1156_v38  ;;  %v196_v18 = vmul.f32 1.442695, %v158_v51 }
  0x31   :  { %708 = vpow2.f32 %v188_v54  ;;  %v198_v20 = vmul.f32 1.442695, %v159_v55  ;;  %v200_v21 = vmul.f32 1.442695, %v160_v56  ;;  %v1225_v25 = vmax.f32 %v131_v58, %v1200_v63 }
  0x32   :  { %710 = vpow2.f32 %v190_v57  ;;  %v134_v23 = vmax.f32 %v133_v0, %v1212_v15  ;;  %v136_v10 = vmax.f32 %v1196_v61, %v1208_v13  ;;  %v166_v27 = vsub.f32 %v1137_v28, %v1159_v39 }
  0x33   :  { %712 = vpow2.f32 %v192_v60  ;;  %v202_v30 = vmul.f32 1.442695, %v161_v59  ;;  %v204_v31 = vmul.f32 1.442695, %v162_v1  ;;  %v140_v41 = vmax.f32 %v139_v26, %v1220_v22 }
  0x34   :  { %714 = vpow2.f32 %v194_v12  ;;  %v1241_v35 = vmax.f32 %v134_v23, %v1222_v24  ;;  %v137_v38 = vmax.f32 %v136_v10, %v1218_v19  ;;  %v167_v28 = vsub.f32 %v1139_v29, %v1162_v40 }
  0x35   :  { %v1238_v34 = vpop.eup %704  ;;  %716 = vpow2.f32 %v196_v18  ;;  %v206_v39 = vmul.f32 1.442695, %v163_v11  ;;  %v208_v43 = vmul.f32 1.442695, %v164_v16  ;;  %v1255_v46 = vmax.f32 %v140_v41, %v1236_v33 }
  0x36   :  { %v1245_v42 = vpop.eup %706  ;;  %718 = vpow2.f32 %v198_v20  ;;  %v1252_v45 = vmax.f32 %v137_v38, %v1234_v32  ;;  %v168_v48 = vsub.f32 %v1151_v36, %v1225_v25  ;;  %v210_v52 = vmul.f32 1.442695, %v165_v17 }
  0x37   :  { %v1249_v44 = vpop.eup %708  ;;  %720 = vpow2.f32 %v200_v21  ;;  %v169_v29 = vsub.f32 %v1180_v49, %v1241_v35  ;;  %v212_v53 = vmul.f32 1.442695, %v166_v27  ;;  %v214_v56 = vmul.f32 1.442695, %v167_v28 }
  0x38   :  { %v1259_v51 = vpop.eup %710  ;;  %722 = vpow2.f32 %v202_v30  ;;  %v170_v54 = vsub.f32 %v1196_v61, %v1252_v45  ;;  %v171_v57 = vsub.f32 %v1198_v62, %v1255_v46  ;;  %v172_v59 = vsub.f32 %v1153_v37, %v1225_v25 }
  0x39   :  { %v1263_v40 = vpop.eup %712  ;;  %724 = vpow2.f32 %v204_v31  ;;  %v216_v60 = vmul.f32 1.442695, %v168_v48  ;;  %v218_v1 = vmul.f32 1.442695, %v169_v29  ;;  %v173_v26 = vsub.f32 %v1182_v50, %v1241_v35 }
  0x3a   :  { %v1267_v55 = vpop.eup %714  ;;  %726 = vpow2.f32 %v206_v39  ;;  %v248_v36 = vadd.f32 %v1263_v40, %v1238_v34  ;;  %v220_v12 = vmul.f32 1.442695, %v170_v54  ;;  %v222_v17 = vmul.f32 1.442695, %v171_v57 }
  0x3b   :  { %v1273_v58 = vpop.eup %716  ;;  %728 = vpow2.f32 %v208_v43  ;;  %v251_v49 = vadd.f32 %v1267_v55, %v1245_v42  ;;  %v224_v21 = vmul.f32 1.442695, %v172_v59  ;;  %v174_v31 = vsub.f32 %v1208_v13, %v1252_v45 }
  0x3c   :  { %v1279_v61 = vpop.eup %718  ;;  %730 = vpow2.f32 %v210_v52  ;;  %v254_v0 = vadd.f32 %v1273_v58, %v1249_v44  ;;  %v175_v28 = vsub.f32 %v1210_v14, %v1255_v46  ;;  %v176_v39 = vsub.f32 %v1176_v47, %v1225_v25 }
  0x3d   :  { %v1283_v11 = vpop.eup %720  ;;  %732 = vpow2.f32 %v212_v53  ;;  %v257_v62 = vadd.f32 %v1279_v61, %v1259_v51  ;;  %v177_v48 = vsub.f32 %v1212_v15, %v1241_v35  ;;  %v180_v13 = vsub.f32 %v1200_v63, %v1225_v25 }
  0x3e   :  { %v1287_v16 = vpop.eup %722  ;;  %734 = vpow2.f32 %v214_v56  ;;  %v249_v37 = vadd.f32 %v1283_v11, %v248_v36  ;;  %v178_v47 = vsub.f32 %v1218_v19, %v1252_v45  ;;  %v226_v14 = vmul.f32 1.442695, %v173_v26 }
  0x3f   :  { %v1290_v18 = vpop.eup %724  ;;  %v252_v20 = vadd.f32 %v1287_v16, %v251_v49  ;;  %736 = vpow2.f32 %v216_v60  ;;  %v179_v15 = vsub.f32 %v1220_v22, %v1255_v46  ;;  %v228_v56 = vmul.f32 1.442695, %v174_v31 }
  0x40   :  { %v1293_v23 = vpop.eup %726  ;;  %v255_v10 = vadd.f32 %v1290_v18, %v254_v0  ;;  %738 = vpow2.f32 %v218_v1  ;;  %v181_v25 = vsub.f32 %v1222_v24, %v1241_v35  ;;  %v182_v36 = vsub.f32 %v1234_v32, %v1252_v45 }
  0x41   :  { %v1298_v27 = vpop.eup %728  ;;  %v258_v30 = vadd.f32 %v1293_v23, %v257_v62  ;;  %740 = vpow2.f32 %v220_v12  ;;  %v230_v19 = vmul.f32 1.442695, %v175_v28  ;;  %v183_v49 = vsub.f32 %v1236_v33, %v1255_v46 }
  0x42   :  { %v1303_v38 = vpop.eup %730  ;;  %v250_v41 = vadd.f32 %v1298_v27, %v249_v37  ;;  %742 = vpow2.f32 %v222_v17  ;;  %v232_v22 = vmul.f32 1.442695, %v176_v39  ;;  %v234_v24 = vmul.f32 1.442695, %v177_v48 }
  0x43   :  { %v1310_v50 = vpop.eup %732  ;;  %v253_v43 = vadd.f32 %v1303_v38, %v252_v20  ;;  %744 = vpow2.f32 %v224_v21  ;;  %v236_v32 = vmul.f32 1.442695, %v178_v47  ;;  %v238_v45 = vmul.f32 1.442695, %v179_v15 }
  0x44   :  { %v1317_v52 = vpop.eup %734  ;;  %v256_v29 = vadd.f32 %v1310_v50, %v255_v10  ;;  %746 = vrcp.f32 %v250_v41  ;;  %v240_v0 = vmul.f32 1.442695, %v180_v13  ;;  %v242_v33 = vmul.f32 1.442695, %v181_v25 }
  0x45   :  { %v1322_v53 = vpop.eup %736  ;;  %v259_v54 = vadd.f32 %v1317_v52, %v258_v30  ;;  %748 = vrcp.f32 %v253_v43  ;;  %v244_v46 = vmul.f32 1.442695, %v182_v36  ;;  %v246_v12 = vmul.f32 1.442695, %v183_v49 }
  0x46   :  { %v1327_v63 = vpop.eup %738  ;;  %750 = vrcp.f32 %v256_v29 }
  0x47   :  { %v1333_v57 = vpop.eup %740  ;;  %752 = vrcp.f32 %v259_v54 }
  0x48   :  { %v1338_v59 = vpop.eup %742  ;;  %754 = vpow2.f32 %v226_v14 }
  0x49   :  { %v1342_v35 = vpop.eup %744  ;;  %756 = vpow2.f32 %v228_v56 }
  0x4a   :  { %v747_v60 = vpop.eup %746  ;;  %758 = vpow2.f32 %v230_v19  ;;  %v260_v37 = vadd.f32 %v1342_v35, %v1322_v53 }
  0x4b   :  { %v749_v1 = vpop.eup %748  ;;  %v1347_v62 = vsel %vm280_vm14, 0.0, %v747_v60  ;;  %760 = vpow2.f32 %v232_v22  ;;  %vm1583_vm14 = vcmp.eq.s32.totalorder %v969_v8, 1 }
  0x4c   :  { %v751_v17 = vpop.eup %750  ;;  %v1353_v20 = vsel %vm281_vm13, 0.0, %v749_v1  ;;  %v296_v21 = vmul.f32 %v1238_v34, %v1347_v62  ;;  %762 = vpow2.f32 %v234_v24  ;;  %v372_v10 = vmul.f32 %v1263_v40, %v1347_v62 }
  0x4d   :  { %v753_v26 = vpop.eup %752  ;;  %v1361_v30 = vsel %vm282_vm15, 0.0, %v751_v17  ;;  %v297_v31 = vmul.f32 %v1245_v42, %v1353_v20  ;;  %764 = vpow2.f32 %v236_v32  ;;  %v373_v41 = vmul.f32 %v1267_v55, %v1353_v20 }
  0x4e   :  { %v1367_v28 = vpop.eup %754  ;;  %v1371_v34 = vsel %vm283_vm4, 0.0, %v753_v26  ;;  %v298_v40 = vmul.f32 %v1249_v44, %v1361_v30  ;;  %766 = vpow2.f32 %v238_v45  ;;  %v326_v39 = vsel %vm304_vm0, %v296_v21, 0.0 }
  0x4f   :  { %v1377_v43 = vpop.eup %756  ;;  %v299_v42 = vmul.f32 %v1259_v51, %v1371_v34  ;;  %v314_v48 = vadd.f32 %v297_v31, %v296_v21  ;;  %768 = vpow2.f32 %v240_v0  ;;  %v263_v55 = vadd.f32 %v1367_v28, %v1327_v63 }
  0x50   :  { %v1383_v13 = vpop.eup %758  ;;  %770 = vpow2.f32 %v242_v33  ;;  %v266_v44 = vadd.f32 %v1377_v43, %v1333_v57  ;;  %v327_v29 = vsel %vm305_vm1, %v297_v31, 0.0  ;;  %v328_v47 = vsel %vm306_vm2, %v298_v40, 0.0 }
  0x51   :  { %v1391_v14 = vpop.eup %760  ;;  %v315_v51 = vadd.f32 %v314_v48, %v298_v40  ;;  %772 = vpow2.f32 %v244_v46  ;;  %v269_v54 = vadd.f32 %v1383_v13, %v1338_v59  ;;  %v329_v15 = vsel %vm307_vm3, %v299_v42, 0.0 }
  0x52   :  { %v1397_v56 = vpop.eup %762  ;;  %774 = vpow2.f32 %v246_v12  ;;  %v261_v25 = vadd.f32 %v1391_v14, %v260_v37  ;;  %v334_v36 = vadd.f32 %v327_v29, %v326_v39  ;;  %v374_v19 = vmul.f32 %v1273_v58, %v1361_v30 }
  0x53   :  { %v1402_v49 = vpop.eup %764  ;;  %v316_v22 = vadd.f32 %v315_v51, %v299_v42  ;;  %v264_v24 = vadd.f32 %v1397_v56, %v263_v55  ;;  %v375_v32 = vmul.f32 %v1279_v61, %v1371_v34  ;;  %v391_v45 = vadd.f32 %v373_v41, %v372_v10 }
  0x54   :  { %v1407_v60 = vpop.eup %766  ;;  %v267_v0 = vadd.f32 %v1402_v49, %v266_v44  ;;  %vm284_vm0 = vcmp.eq.s32.totalorder %v965_v6, 4294967295  ;;  %v335_v33 = vadd.f32 %v334_v36, %v328_v47  ;;  %v404_v46 = vsel %vm380_vm8, %v372_v10, 0.0 }
  0x55   :  { %v405_v58 = vsel %vm381_vm9, %v373_v41, 0.0  ;;  %v1415_v1 = vpop.eup %768  ;;  %v270_v12 = vadd.f32 %v1407_v60, %v269_v54  ;;  %vm285_vm1 = vcmp.eq.s32.totalorder %v967_v7, 4294967295  ;;  %v392_v61 = vadd.f32 %v391_v45, %v374_v19  ;;  %322 = vst [vmem:[#allocation8] sm:$0xff] %v316_v22 }
  0x56   :  { %v406_v37 = vsel %vm382_vm10, %v374_v19, 0.0  ;;  %v1421_v17 = vpop.eup %770  ;;  %v262_v21 = vadd.f32 %v1415_v1, %v261_v25  ;;  %v336_v26 = vadd.f32 %v335_v33, %v329_v15  ;;  %v407_v10 = vsel %vm383_vm11, %v375_v32, 0.0 }
  0x57   :  { %v412_v31 = vadd.f32 %v405_v58, %v404_v46  ;;  %v1426_v41 = vpop.eup %772  ;;  %v265_v40 = vadd.f32 %v1421_v17, %v264_v24  ;;  %v393_v39 = vadd.f32 %v392_v61, %v375_v32  ;;  %v451_v42 = vmul.f32 %v1283_v11, %v1347_v62 }
  0x58   :  { %v452_v48 = vmul.f32 %v1287_v16, %v1353_v20  ;;  %v1433_v55 = vpop.eup %774  ;;  %v268_v44 = vadd.f32 %v1426_v41, %v267_v0  ;;  %776 = vrcp.f32 %v262_v21  ;;  %v453_v51 = vmul.f32 %v1290_v18, %v1361_v30  ;;  %342 = vst [vmem:[#allocation11] sm:$0xff] %v336_v26 }
  0x59   :  { %v413_v29 = vadd.f32 %v412_v31, %v406_v37  ;;  %v271_v47 = vadd.f32 %v1433_v55, %v270_v12  ;;  %778 = vrcp.f32 %v265_v40  ;;  %v454_v11 = vmul.f32 %v1293_v23, %v1371_v34  ;;  %399 = vst [vmem:[#allocation8 + $0x10] sm:$0xff] %v393_v39 }
  0x5a   :  { %780 = vrcp.f32 %v268_v44  ;;  %v470_v15 = vadd.f32 %v452_v48, %v451_v42  ;;  %v483_v16 = vsel %vm459_vm7, %v451_v42, 0.0  ;;  %vm1574_vm2 = vcmp.eq.s32.totalorder %v959_v3, 2 }
  0x5b   :  { %v414_v54 = vadd.f32 %v413_v29, %v407_v10  ;;  %782 = vrcp.f32 %v271_v47  ;;  %v484_v25 = vsel %vm1574_vm2, %v452_v48, 0.0  ;;  %vm1575_vm3 = vcmp.eq.s32.totalorder %v961_v4, 2 }
  0x5c   :  { %v485_v36 = vsel %vm1575_vm3, %v453_v51, 0.0  ;;  %vm286_vm4 = vcmp.eq.s32.totalorder %v969_v8, 4294967295  ;;  %v471_v18 = vadd.f32 %v470_v15, %v453_v51  ;;  %v491_v19 = vadd.f32 %v484_v25, %v483_v16 }
  0x5d   :  { %vm287_vm8 = vcmp.eq.s32.totalorder %v971_v9, 4294967295  ;;  %vm1576_vm9 = vcmp.eq.s32.totalorder %v963_v5, 2  ;;  %v530_v22 = vmul.f32 %v1298_v27, %v1347_v62  ;;  %v531_v24 = vmul.f32 %v1303_v38, %v1353_v20  ;;  %420 = vst [vmem:[#allocation11 + $0x10] sm:$0xff] %v414_v54 }
  0x5e   :  { %v486_v23 = vsel %vm1576_vm9, %v454_v11, 0.0  ;;  %v777_v32 = vpop.eup %776  ;;  %v472_v45 = vadd.f32 %v471_v18, %v454_v11  ;;  %v492_v0 = vadd.f32 %v491_v19, %v485_v36  ;;  %v1457_v33 = vmul.f32 %v1310_v50, %v1361_v30 }
  0x5f   :  { %v1461_v46 = vmul.f32 %v1317_v52, %v1371_v34  ;;  %v779_v58 = vpop.eup %778  ;;  %v292_v12 = vsel %vm284_vm0, 0.0, %v777_v32  ;;  %v549_v27 = vadd.f32 %v531_v24, %v530_v22  ;;  %v1467_v38 = vsel %vm538_vm5, %v530_v22, 0.0 }
  0x60   :  { %v1471_v62 = vsel %vm539_vm12, %v531_v24, 0.0  ;;  %v781_v20 = vpop.eup %780  ;;  %v293_v50 = vsel %vm285_vm1, 0.0, %v779_v58  ;;  %v300_v52 = vmul.f32 %v1322_v53, %v292_v12  ;;  %v376_v30 = vmul.f32 %v1342_v35, %v292_v12  ;;  %478 = vst [vmem:[#allocation8 + $0x20] sm:$0xff] %v472_v45 }
  0x61   :  { %v783_v34 = vpop.eup %782  ;;  %v294_v61 = vsel %vm286_vm4, 0.0, %v781_v20  ;;  %v301_v2 = vmul.f32 %v1327_v63, %v293_v50  ;;  %v377_v37 = vmul.f32 %v1367_v28, %v293_v50  ;;  %v455_v3 = vmul.f32 %v1391_v14, %v292_v12 }
  0x62   :  { %v295_v21 = vsel %vm287_vm8, 0.0, %v783_v34  ;;  %v302_v26 = vmul.f32 %v1333_v57, %v294_v61  ;;  %vm1577_vm5 = vcmp.eq.s32.totalorder %v965_v6, 0  ;;  %v378_v35 = vmul.f32 %v1377_v43, %v294_v61 }
  0x63   :  { %v330_v53 = vsel %vm1577_vm5, %v300_v52, 0.0  ;;  %v303_v10 = vmul.f32 %v1338_v59, %v295_v21  ;;  %v317_v31 = vadd.f32 %v301_v2, %v300_v52  ;;  %vm1578_vm7 = vcmp.eq.s32.totalorder %v967_v7, 0 }
  0x64   :  { %v331_v63 = vsel %vm1578_vm7, %v301_v2, 0.0  ;;  %v379_v28 = vmul.f32 %v1383_v13, %v295_v21  ;;  %vm1579_vm10 = vcmp.eq.s32.totalorder %v969_v8, 0  ;;  %v394_v39 = vadd.f32 %v377_v37, %v376_v30 }
  0x65   :  { %v332_v14 = vsel %vm1579_vm10, %v302_v26, 0.0  ;;  %v337_v40 = vadd.f32 %v331_v63, %v330_v53  ;;  %vm1580_vm11 = vcmp.eq.s32.totalorder %v965_v6, 1  ;;  %v318_v42 = vadd.f32 %v317_v31, %v302_v26 }
  0x66   :  { %v408_v57 = vsel %vm1580_vm11, %v376_v30, 0.0  ;;  %vm1581_vm12 = vcmp.eq.s32.totalorder %v971_v9, 0  ;;  %vm1582_vm13 = vcmp.eq.s32.totalorder %v967_v7, 1  ;;  %v410_v48 = vsel %vm1583_vm14, %v378_v35, 0.0 }
  0x67   :  { %v333_v43 = vsel %vm1581_vm12, %v303_v10, 0.0  ;;  %v409_v59 = vsel %vm1582_vm13, %v377_v37, 0.0  ;;  %v338_v44 = vadd.f32 %v337_v40, %v332_v14  ;;  %v395_v13 = vadd.f32 %v394_v39, %v378_v35 }
  0x68   :  { %vm1584_vm15 = vcmp.eq.s32.totalorder %v971_v9, 1  ;;  %v415_v47 = vadd.f32 %v409_v59, %v408_v57  ;;  %v319_v51 = vadd.f32 %v318_v42, %v303_v10  ;;  %v456_v54 = vmul.f32 %v1397_v56, %v293_v50 }
  0x69   :  { %v411_v29 = vsel %vm1584_vm15, %v379_v28, 0.0  ;;  %v457_v11 = vmul.f32 %v1402_v49, %v294_v61  ;;  %v458_v15 = vmul.f32 %v1407_v60, %v295_v21  ;;  %v339_v16 = vadd.f32 %v338_v44, %v333_v43 }
  0x6a   :  { %v396_v25 = vadd.f32 %v395_v13, %v379_v28  ;;  %v416_v36 = vadd.f32 %v415_v47, %v410_v48  ;;  %v493_v18 = vadd.f32 %v492_v0, %v486_v23  ;;  %v473_v19 = vadd.f32 %v456_v54, %v455_v3  ;;  %323 = vst [vmem:[#allocation8 + $0x8] sm:$0xff] %v319_v51 }
  0x6b   :  { %vm1585_vm0 = vcmp.eq.s32.totalorder %v965_v6, 2  ;;  %vm1586_vm1 = vcmp.eq.s32.totalorder %v967_v7, 2  ;;  %vm1587_vm2 = vcmp.eq.s32.totalorder %v969_v8, 2  ;;  %vm1588_vm3 = vcmp.eq.s32.totalorder %v971_v9, 2  ;;  %343 = vst [vmem:[#allocation11 + $0x8] sm:$0xff] %v339_v16 }
  0x6c   :  { %v487_v22 = vsel %vm1585_vm0, %v455_v3, 0.0  ;;  %v488_v24 = vsel %vm1586_vm1, %v456_v54, 0.0  ;;  %v417_v32 = vadd.f32 %v416_v36, %v411_v29  ;;  %v474_v45 = vadd.f32 %v473_v19, %v457_v11  ;;  %400 = vst [vmem:[#allocation8 + $0x18] sm:$0xff] %v396_v25 }
  0x6d   :  { %v489_v56 = vsel %vm1587_vm2, %v457_v11, 0.0  ;;  %v490_v49 = vsel %vm1588_vm3, %v458_v15, 0.0  ;;  %v494_v60 = vadd.f32 %v488_v24, %v487_v22  ;;  %v550_v23 = vadd.f32 %v549_v27, %v1457_v33  ;;  %499 = vst [vmem:[#allocation11 + $0x20] sm:$0xff] %v493_v18 }
  0x6e   :  { %v534_v0 = vmul.f32 %v1415_v1, %v292_v12  ;;  %v535_v58 = vmul.f32 %v1421_v17, %v293_v50  ;;  %v475_v20 = vadd.f32 %v474_v45, %v458_v15  ;;  %v536_v30 = vmul.f32 %v1426_v41, %v294_v61  ;;  %421 = vst [vmem:[#allocation11 + $0x18] sm:$0xff] %v417_v32 }
  0x6f   :  { %v495_v52 = vadd.f32 %v494_v60, %v489_v56  ;;  %v537_v34 = vmul.f32 %v1433_v55, %v295_v21  ;;  %v551_v2 = vadd.f32 %v550_v23, %v1461_v46  ;;  %vm1589_vm4 = vcmp.eq.s32.totalorder %v961_v4, 3 }
  0x70   :  { %v552_v37 = vadd.f32 %v535_v58, %v534_v0  ;;  %v564_v3 = vsel %vm1589_vm4, %v1457_v33, 0.0  ;;  %v565_v1 = vsel %vm541_vm6, %v1461_v46, 0.0  ;;  %v570_v12 = vadd.f32 %v1471_v62, %v1467_v38  ;;  %479 = vst [vmem:[#allocation8 + $0x28] sm:$0xff] %v475_v20 }
  0x71   :  { %v496_v17 = vadd.f32 %v495_v52, %v490_v49  ;;  %vm1590_vm8 = vcmp.eq.s32.totalorder %v965_v6, 3  ;;  %vm1591_vm9 = vcmp.eq.s32.totalorder %v967_v7, 3  ;;  %vm1592_vm5 = vcmp.eq.s32.totalorder %v969_v8, 3  ;;  %557 = vst [vmem:[#allocation8 + $0x30] sm:$0xff] %v551_v2 }
  0x72   :  { %v566_v41 = vsel %vm1590_vm8, %v534_v0, 0.0  ;;  %v553_v55 = vadd.f32 %v552_v37, %v536_v30  ;;  %v567_v27 = vsel %vm1591_vm9, %v535_v58, 0.0  ;;  %v568_v4 = vsel %vm1592_vm5, %v536_v30, 0.0 }
  0x73   :  { %v571_v33 = vadd.f32 %v570_v12, %v564_v3  ;;  %v573_v50 = vadd.f32 %v567_v27, %v566_v41  ;;  %vm1593_vm6 = vcmp.eq.s32.totalorder %v971_v9, 3  ;;  %500 = vst [vmem:[#allocation11 + $0x28] sm:$0xff] %v496_v17 }
  0x74   :  { %v554_v5 = vadd.f32 %v553_v55, %v537_v34  ;;  %v569_v6 = vsel %vm1593_vm6, %v537_v34, 0.0 }
  0x75   :  { %v572_v7 = vadd.f32 %v571_v33, %v565_v1  ;;  %v574_v46 = vadd.f32 %v573_v50, %v568_v4 }
  0x76   :  { %558 = vst [vmem:[#allocation8 + $0x38] sm:$0xff] %v554_v5 }
  0x77   :  { %v575_v8 = vadd.f32 %v574_v46, %v569_v6  ;;  %578 = vst [vmem:[#allocation11 + $0x30] sm:$0xff] %v572_v7  ;;  %621 = dma.vmem_to_hbm [thread:$0]  %s614_s30, 1024, %s616_s7, [#allocation5], %s913_s23, %s913_s23, %s914_s24  }
  0x79   :  { %579 = vst [vmem:[#allocation11 + $0x38] sm:$0xff] %v575_v8 }
  0x7a   :  { %647 = dma.vmem_to_hbm [thread:$0]  %s640_s9, 1024, %s642_s12, [#allocation10], %s913_s23, %s913_s23, %s914_s24  }
  0x7b   :  { %908 = dma.done.wait [#allocation5], 1024  }
  0x7c   :  { %909 = vsyncadd [#allocation5], 4294966272 }
  0x7d   :  { %910 = dma.done.wait [#allocation10], 2048  }
  0x7e   :  { %911 = vsyncadd [#allocation10], 4294965248 }
  0x7f   :  { %660 = vsyncpa [#allocation4], 1 }
  0x80   :  { %661 = vsyncpa [#allocation7], 1 }
  0x81   :  { %662 = vsyncpa [#allocation5], 1 }
  0x82   :  { %663 = vsyncpa [#allocation10], 1 }

</bundles_post_ra>
